<compile_context>
chip_gen: v6e
topology: v6e:2x2x1
jax: 0.10.0
libtpu: 0.0.40
codegen_flags: <defaults>
</compile_context>

<pallas_src>
import functools

import numpy as np

import jax
import jax.numpy as jnp
from jax.experimental import pallas as pl
from jax.experimental.pallas import tpu as pltpu

_LANE = 128
_SUBLANE = 8


def _round_up(x, m):
    return -(-x // m) * m


def _largest_aligned_divisor(dim, cap, align):
    """Largest t <= cap with t % align == 0 and dim % t == 0 (dim is a multiple of align)."""
    best = align
    for t in range(align, min(cap, dim) + 1, align):
        if dim % t == 0:
            best = t
    return best


def _vmem_capacity_bytes():
    """Per-core VMEM capacity; conservative fallback = v7x (64 MiB/TC)."""
    try:
        info = pltpu.get_tpu_info()
        cap = getattr(info, "vmem_capacity_bytes", None)
        if cap:
            return int(cap)
    except Exception:
        pass
    return 64 * 1024 * 1024


def _select_tiles(M, K, N, in_itemsize, out_itemsize, tile_budget):
    """Pick padded dims and tile sizes respecting (8,128) tiling and the VMEM budget."""
    Kp = _round_up(K, _LANE)
    Np = _round_up(N, _LANE)
    tm = min(512, _round_up(M, _SUBLANE))
    Mp = _round_up(M, tm)

    def vmem_bytes(tm_, tk_, tn_):
        # x / w tiles double-buffered by the pipeline; count 2 buffers for the
        # f32 output tile too (conservative) plus the bias row.
        return (2 * (tm_ * tk_ + tk_ * tn_) * in_itemsize
                + 2 * tm_ * tn_ * out_itemsize
                + 2 * Np * out_itemsize)

    if vmem_bytes(tm, Kp, Np) <= tile_budget:
        # Weight-resident: one (Kp, Np) weight block shared by every batch tile.
        tk, tn = Kp, Np
    else:
        tk = _largest_aligned_divisor(Kp, 512, _LANE)
        tn = _largest_aligned_divisor(Np, 512, _LANE)
        while tm > _SUBLANE and vmem_bytes(tm, tk, tn) > tile_budget:
            tm = max(_SUBLANE, _round_up(tm // 2, _SUBLANE))
        Mp = _round_up(M, tm)

    # Megacore (v7x has 2 TCs): prefer >=2 steps on a parallel grid axis when free.
    if Mp // tm == 1 and Np // tn == 1 and tm > _SUBLANE:
        half = tm // 2
        if half % _SUBLANE == 0 and Mp % half == 0:
            tm = half

    return Mp, Kp, Np, tm, tk, tn


def _linear_kernel(x_ref, w_ref, b_ref, o_ref):
    """One (tm, tn) f32 output tile, accumulated in place across the K grid axis."""
    k = pl.program_id(2)

    @pl.when(k == 0)
    def _():
        o_ref[...] = jnp.zeros_like(o_ref)

    o_ref[...] += jnp.dot(
        x_ref[...], w_ref[...], preferred_element_type=jnp.float32
    )

    @pl.when(k == pl.num_programs(2) - 1)
    def _():
        # Fused bias epilogue: (1, tn) row broadcast over the tm rows.
        o_ref[...] = o_ref[...] + b_ref[...]


@functools.partial(
    jax.jit,
    static_argnames=("Mp", "Kp", "Np", "tm", "tk", "tn", "compute_dtype", "vmem_limit"),
)
def _syntdp_forward_impl(x, weight, bias2d, *, Mp, Kp, Np, tm, tk, tn,
                         compute_dtype, vmem_limit):
    M, K = x.shape
    _, N = weight.shape

    # Zero-pad to lane-dense, tile-aligned shapes (extra K columns/rows are
    # zeros so they do not change the matmul result).
    xp = jnp.pad(x, ((0, Mp - M), (0, Kp - K))).astype(compute_dtype)
    wp = jnp.pad(weight, ((0, Kp - K), (0, Np - N))).astype(compute_dtype)
    bp = jnp.pad(bias2d, ((0, 0), (0, Np - N))).astype(jnp.float32)

    grid = (Mp // tm, Np // tn, Kp // tk)
    in_bytes = np.dtype(compute_dtype).itemsize

    out = pl.pallas_call(
        _linear_kernel,
        out_shape=jax.ShapeDtypeStruct((Mp, Np), jnp.float32),
        grid_spec=pltpu.PrefetchScalarGridSpec(
            num_scalar_prefetch=0,
            grid=grid,
            in_specs=[
                pl.BlockSpec((tm, tk), lambda i, j, k: (i, k)),   # x tile
                pl.BlockSpec((tk, tn), lambda i, j, k: (k, j)),   # weight tile
                pl.BlockSpec((1, tn), lambda i, j, k: (0, j)),    # bias row
            ],
            out_specs=pl.BlockSpec((tm, tn), lambda i, j, k: (i, j)),
        ),
        compiler_params=pltpu.CompilerParams(
            dimension_semantics=("parallel", "parallel", "arbitrary"),
            vmem_limit_bytes=int(vmem_limit),
        ),
        cost_estimate=pl.CostEstimate(
            flops=2 * M * K * N,
            bytes_accessed=(M * K + K * N) * in_bytes + (N + M * N) * 4,
            transcendentals=0,
        ),
    )(xp, wp, bp)

    return out[:M, :N]


def syntdp_forward(x, weight, bias=None, *, use_bias=True, compute_dtype=None):
    """SYNTDP.forward: x @ weight + bias (f32 accumulation on the MXU).

    x:      (M, K) float32
    weight: (K, N) float32
    bias:   (N,)   float32 (ignored when use_bias=False)
    compute_dtype: optional cast of x/weight (e.g. jnp.bfloat16) for v6e/v7x
                   MXU throughput; accumulation / bias / output stay float32.
    """
    M, K = x.shape
    K2, N = weight.shape
    assert K == K2, (K, K2)

    if compute_dtype is None:
        compute_dtype = x.dtype
    compute_dtype = np.dtype(compute_dtype)

    if bias is None or not use_bias:
        bias2d = jnp.zeros((1, N), dtype=jnp.float32)
    else:
        bias2d = bias.reshape(1, N).astype(jnp.float32)

    vmem_cap = _vmem_capacity_bytes()
    tile_budget = vmem_cap // 4          # leave headroom for compiler scratch
    vmem_limit = (vmem_cap * 3) // 4     # raise scoped limit above the default

    Mp, Kp, Np, tm, tk, tn = _select_tiles(
        M, K, N, compute_dtype.itemsize, 4, tile_budget
    )

    return _syntdp_forward_impl(
        x, weight, bias2d,
        Mp=Mp, Kp=Kp, Np=Np, tm=tm, tk=tk, tn=tn,
        compute_dtype=compute_dtype, vmem_limit=vmem_limit,
    )


# TODO(synk): STDP.update / SYNTDP.weight_update (stateful eligibility-trace
# training loop over time steps) are training-time helpers, not part of
# forward(); not implemented as a Pallas kernel.


if __name__ == "__main__":
    # Deterministic parameters/inputs mimicking torch.randn in SYNTDP.__init__.
    batch, in_units, out_units = 8, 32, 32

    key = jax.random.PRNGKey(0)
    k_x, k_w, k_b = jax.random.split(key, 3)
    x = jax.random.normal(k_x, (batch, in_units), dtype=jnp.float32)
    weight = jax.random.normal(k_w, (in_units, out_units), dtype=jnp.float32)
    bias = jax.random.normal(k_b, (out_units,), dtype=jnp.float32)

    # f32 path (matches the PyTorch module's numerics).
    out = syntdp_forward(x, weight, bias)
    out = jax.block_until_ready(out)

    ref = x @ weight + bias
    assert out.shape == (batch, out_units)
    assert jnp.allclose(out, ref, atol=1e-5, rtol=1e-5), "mismatch vs reference"

    # Optional bf16-operand path (native MXU dtype on v6e/v7x); f32 accumulation.
    out_bf16 = syntdp_forward(x, weight, bias, compute_dtype=jnp.bfloat16)
    out_bf16 = jax.block_until_ready(out_bf16)
    assert out_bf16.shape == (batch, out_units)
    assert bool(jnp.all(jnp.isfinite(out_bf16)))

    print("KERNEL_OK")
</pallas_src>

<mosaic_0001>
module attributes {stable_mosaic.version = 11 : i64} {
  func.func @_linear_kernel(%arg0: i32, %arg1: i32, %arg2: i32, %arg3: memref<8x128xf32, #tpu.memory_space<vmem>>, %arg4: memref<128x128xf32, #tpu.memory_space<vmem>>, %arg5: memref<1x128xf32, #tpu.memory_space<vmem>>, %arg6: memref<8x128xf32, #tpu.memory_space<vmem>>) attributes {dimension_semantics = [#tpu.dimension_semantics<parallel>, #tpu.dimension_semantics<parallel>, #tpu.dimension_semantics<arbitrary>], iteration_bounds = array<i64: 1, 1, 1>, scalar_prefetch = 0 : i64, scratch_operands = 0 : i64, tpu.core_type = #tpu.core_type<tc>, window_params = [{transform_indices = @transform_0, window_bounds = array<i64: 8, 128>}, {transform_indices = @transform_1, window_bounds = array<i64: 128, 128>}, {transform_indices = @transform_2, window_bounds = array<i64: 1, 128>}, {transform_indices = @transform_3, window_bounds = array<i64: 8, 128>}]} {
    %c0_i32 = arith.constant 0 : i32
    %0 = arith.cmpi eq, %arg2, %c0_i32 : i32
    %1 = arith.extui %0 : i1 to i32
    %c0_i32_0 = arith.constant 0 : i32
    %2 = arith.cmpi ne, %1, %c0_i32_0 : i32
    scf.if %2 {
      %cst_10 = arith.constant 0.000000e+00 : f32
      %12 = vector.broadcast %cst_10 : f32 to vector<8x128xf32>
      %c0_11 = arith.constant 0 : index
      %c0_12 = arith.constant 0 : index
      %13 = vector.load %arg6[%c0_11, %c0_12] : memref<8x128xf32, #tpu.memory_space<vmem>>, vector<8x128xf32>
      tpu.vector_store %arg6[%c0_11, %c0_12], %12 {strides = array<i32>} : memref<8x128xf32, #tpu.memory_space<vmem>>, vector<8x128xf32>,
    } else {
    }
    %c0 = arith.constant 0 : index
    %c0_1 = arith.constant 0 : index
    %3 = vector.load %arg6[%c0, %c0_1] : memref<8x128xf32, #tpu.memory_space<vmem>>, vector<8x128xf32>
    %c0_2 = arith.constant 0 : index
    %c0_3 = arith.constant 0 : index
    %4 = vector.load %arg3[%c0_2, %c0_3] : memref<8x128xf32, #tpu.memory_space<vmem>>, vector<8x128xf32>
    %c0_4 = arith.constant 0 : index
    %c0_5 = arith.constant 0 : index
    %5 = vector.load %arg4[%c0_4, %c0_5] : memref<128x128xf32, #tpu.memory_space<vmem>>, vector<128x128xf32>
    %cst = arith.constant dense<0.000000e+00> : vector<8x128xf32>
    %6 = tpu.matmul %4, %5, %cst {dimension_numbers = #tpu.dot_dimension_numbers<[1], [0], [0], [1], [0, 0, 1, 1], [], []>} : vector<8x128xf32>, vector<128x128xf32>, vector<8x128xf32> -> vector<8x128xf32>
    %7 = arith.addf %3, %6 : vector<8x128xf32>
    %c0_6 = arith.constant 0 : index
    %c0_7 = arith.constant 0 : index
    %8 = vector.load %arg6[%c0_6, %c0_7] : memref<8x128xf32, #tpu.memory_space<vmem>>, vector<8x128xf32>
    tpu.vector_store %arg6[%c0_6, %c0_7], %7 {strides = array<i32>} : memref<8x128xf32, #tpu.memory_space<vmem>>, vector<8x128xf32>,
    %c0_i32_8 = arith.constant 0 : i32
    %9 = arith.cmpi eq, %arg2, %c0_i32_8 : i32
    %10 = arith.extui %9 : i1 to i32
    %c0_i32_9 = arith.constant 0 : i32
    %11 = arith.cmpi ne, %10, %c0_i32_9 : i32
    scf.if %11 {
      %c0_10 = arith.constant 0 : index
      %c0_11 = arith.constant 0 : index
      %12 = vector.load %arg6[%c0_10, %c0_11] : memref<8x128xf32, #tpu.memory_space<vmem>>, vector<8x128xf32>
      %c0_12 = arith.constant 0 : index
      %c0_13 = arith.constant 0 : index
      %13 = vector.load %arg5[%c0_12, %c0_13] : memref<1x128xf32, #tpu.memory_space<vmem>>, vector<1x128xf32>
      %14 = vector.broadcast %13 : vector<1x128xf32> to vector<8x128xf32>
      %15 = arith.addf %12, %14 : vector<8x128xf32>
      %c0_14 = arith.constant 0 : index
      %c0_15 = arith.constant 0 : index
      %16 = vector.load %arg6[%c0_14, %c0_15] : memref<8x128xf32, #tpu.memory_space<vmem>>, vector<8x128xf32>
      tpu.vector_store %arg6[%c0_14, %c0_15], %15 {strides = array<i32>} : memref<8x128xf32, #tpu.memory_space<vmem>>, vector<8x128xf32>,
    } else {
    }
    return
  }
  func.func @transform_0(%arg0: i32, %arg1: i32, %arg2: i32) -> (i32, i32) {
    %c0_i32 = arith.constant 0 : i32
    return %arg0, %arg2 : i32, i32
  }
  func.func @transform_1(%arg0: i32, %arg1: i32, %arg2: i32) -> (i32, i32) {
    %c0_i32 = arith.constant 0 : i32
    return %arg2, %arg1 : i32, i32
  }
  func.func @transform_2(%arg0: i32, %arg1: i32, %arg2: i32) -> (i32, i32) {
    %c0_i32 = arith.constant 0 : i32
    %c0_i32_0 = arith.constant 0 : i32
    return %c0_i32, %arg1 : i32, i32
  }
  func.func @transform_3(%arg0: i32, %arg1: i32, %arg2: i32) -> (i32, i32) {
    %c0_i32 = arith.constant 0 : i32
    return %arg0, %arg1 : i32, i32
  }
}

</mosaic_0001>

<bundles_post_ra>
// kernel: _syntdp_forward_impl.1
= control target key start
LH: loop header
LB: loop body
LE: loop exit
PB: predicated region body
PF: predicated region fallthrough
CT: control target
= control target key end

     0   :  { %v215_v1 = vmov 0.0   ;;  %vm216_vm0 = vmmov 0   ;;  %s295_s0 = inlined_call_operand.vmem [shape: f32[8,128], index: 0, kind: input, shape index: {}]   ;;  %s296_s1 = inlined_call_operand.vmem [shape: f32[128,128], index: 1, kind: input, shape index: {}]   ;;  %s297_s2 = inlined_call_operand.vmem [shape: f32[1,128], index: 2, kind: input, shape index: {}]   ;;  %s298_s3 = inlined_call_operand.hbm [shape: f32[8,128], index: 3, kind: output, shape index: {}]  }
   0x1   :  { %v37_v0 = vld [vmem:[%s296_s1 + $0x78] sm:$0xff]  ;;  %155 = vmatprep.subr.mxu0 %v215_v1  ;;  %v36_v2 = vld [vmem:[%s296_s1 + $0x70] sm:$0xff]  ;;  %187 = vmatprep.mubr.msk.f32.mxu0 %vm216_vm0, %v215_v1  ;;  %v35_v3 = vld [vmem:[%s296_s1 + $0x68] sm:$0xff] }
   0x2   :  { %156 = vmatpush3.msra.mxu0 %v37_v0  ;;  %v34_v4 = vld [vmem:[%s296_s1 + $0x60] sm:$0xff] }
   0x3   :  { %157 = vmatprep.subr.mxu0 %v215_v1 }
   0x4   :  { %158 = vmatpush3.msra.mxu0 %v36_v2 }
   0x5   :  { %159 = vmatprep.subr.mxu0 %v215_v1 }
   0x6   :  { %8 = vsyncpa [#allocation3], 0  ;;  %160 = vmatpush3.msra.mxu0 %v35_v3  ;;  %v33_v5 = vld [vmem:[%s296_s1 + $0x58] sm:$0xff]  ;;  %v32_v6 = vld [vmem:[%s296_s1 + $0x50] sm:$0xff]  ;;  %s217_s21 = smov [#allocation2]  }
   0x7   :  { %161 = vmatprep.subr.mxu0 %v215_v1  ;;  %v31_v7 = vld [vmem:[%s296_s1 + $0x48] sm:$0xff]  ;;  %v30_v8 = vld [vmem:[%s296_s1 + $0x40] sm:$0xff]  ;;  %v29_v9 = vld [vmem:[%s296_s1 + $0x38] sm:$0xff]  ;;  %s129_s22 = sshll.u32 %s217_s21, 4  ;;  %s130_s22 = int_to_ptr.vmem [resolvable:$true] %s129_s22 }
   0x8   :  { %162 = vmatpush3.msra.mxu0 %v34_v4  ;;  %v28_v10 = vld [vmem:[%s296_s1 + $0x30] sm:$0xff]  ;;  %v27_v11 = vld [vmem:[%s296_s1 + $0x28] sm:$0xff]  ;;  %v26_v12 = vld [vmem:[%s296_s1 + $0x20] sm:$0xff]  ;;  %p198_p1 = scmp.lt.s32.totalorder %s130_s22, %s130_s22 }
   0x9   :  { %163 = vmatprep.subr.mxu0 %v215_v1  ;;  %v25_v13 = vld [vmem:[%s296_s1 + $0x18] sm:$0xff]  ;;  %v24_v14 = vld [vmem:[%s296_s1 + $0x10] sm:$0xff]  ;;  %v23_v15 = vld [vmem:[%s296_s1 + $0x8] sm:$0xff] }
   0xa   :  { %164 = vmatpush3.msra.mxu0 %v33_v5  ;;  %v22_v16 = vld [vmem:[%s296_s1] sm:$0xff]  ;;  %s193_s1 = scalar_lea.vmem %s130_s22, 128 }
   0xb   :  { %165 = vmatprep.subr.mxu0 %v215_v1  ;;  %v21_v17 = vld [vmem:[%s295_s0] sm:$0xff]  ;;  %p194_p0 = scmp.ne.s32.totalorder %s130_s22, %s193_s1  ;;  %p199_p2 = scmp.lt.s32.totalorder %s193_s1, %s193_s1 }
   0xc   :  { %166 = vmatpush3.msra.mxu0 %v32_v6  ;;  %v137_v19 = vld [vmem:[%s297_s2] ss:$0 sm:$0xff] }
   0xd   :  { %167 = vmatprep.subr.mxu0 %v215_v1  ;;  %p200_p3 = por %p199_p2, %p198_p1 }
   0xe   :  { %168 = vmatpush3.msra.mxu0 %v31_v7 }
   0xf   :  { %169 = vmatprep.subr.mxu0 %v215_v1  ;;  %p201_p4 = pnand %p200_p3, %p194_p0 }
  0x10   :  { %170 = vmatpush3.msra.mxu0 %v30_v8 }
  0x11   :  { %171 = vmatprep.subr.mxu0 %v215_v1 }
  0x12   :  { %172 = vmatpush3.msra.mxu0 %v29_v9 }
  0x13   :  { %173 = vmatprep.subr.mxu0 %v215_v1 }
  0x14   :  { %174 = vmatpush3.msra.mxu0 %v28_v10 }
  0x15   :  { %175 = vmatprep.subr.mxu0 %v215_v1 }
  0x16   :  { %176 = vmatpush3.msra.mxu0 %v27_v11 }
  0x17   :  { %177 = vmatprep.subr.mxu0 %v215_v1 }
  0x18   :  { %178 = vmatpush3.msra.mxu0 %v26_v12 }
  0x19   :  { %179 = vmatprep.subr.mxu0 %v215_v1 }
  0x1a   :  { %180 = vmatpush3.msra.mxu0 %v25_v13 }
  0x1b   :  { %181 = vmatprep.subr.mxu0 %v215_v1 }
  0x1c   :  { %182 = vmatpush3.msra.mxu0 %v24_v14 }
  0x1d   :  { %183 = vmatprep.subr.mxu0 %v215_v1 }
  0x1e   :  { %184 = vmatpush3.msra.mxu0 %v23_v15 }
  0x1f   :  { %185 = vmatprep.subr.mxu0 %v215_v1 }
  0x20   :  { %186 = vmatpush3.msra.mxu0 %v22_v16 }
  0x21   :  { %188 = vmatmul.mubr.f32.vlgmr.msra.gmra.mxu0 %v21_v17 }
  0xe1   :  { %v104_v18 = vpop.f32.mrf.mxu0 }
  0xe2   :  { %v121_v21 = vadd.f32 %v137_v19, %v104_v18 }
  0xe3   :  { %v189_v20 = vpop.f32.mrf.mxu0 }
  0xe4   :  { %122 = vst [vmem:[#allocation2] sm:$0xff] %v121_v21 }
  0xe5   :  { %204 = shalt.err (!%p201_p4)
}
  0xe6   :  { %132 = dma.vmem_to_hbm [thread:$0]  %s130_s22, 128, %s298_s3, [#allocation3]  }
  0xe7   :  { %213 = dma.done.wait [#allocation3], 128  }
  0xe8   :  { %214 = vsyncadd [#allocation3], 4294967168 }
  0xe9   :  { %136 = vsyncpa [#allocation3], 1 }

</bundles_post_ra>
